<compile_context>
chip_gen: v6e
topology: v6e:2x2x1
jax: 0.10.0
libtpu: 0.0.40
codegen_flags: <defaults>
</compile_context>

<pallas_src>
import jax
import jax.numpy as jnp
from jax.experimental import pallas as pl
from jax.experimental.pallas import tpu as pltpu

BN_EPS = 1e-5
LANE = 128


def _ceil_to(x, m):
    return pl.cdiv(x, m) * m


# ---------------------------------------------------------------------------
# Pass 1: im2col-matmul + per-tile partial BN statistics (one traversal).
# ---------------------------------------------------------------------------
def conv_stats_kernel(p_ref, w_ref, y_ref, ssum_ref, ssq_ref):
    # p_ref: (TM, KP) bf16 patches    w_ref: (KP, CP) bf16 weights
    # y_ref: (TM, CP) f32 raw conv    ssum/ssq: (1, 1, CP) f32 per-tile partials
    acc = jnp.dot(p_ref[...], w_ref[...], preferred_element_type=jnp.float32)
    y_ref[...] = acc
    ssum_ref[...] = jnp.sum(acc, axis=0, keepdims=True)[None]
    ssq_ref[...] = jnp.sum(acc * acc, axis=0, keepdims=True)[None]


# ---------------------------------------------------------------------------
# Pass 2: apply folded BatchNorm (y*scale + shift) + ReLU.
# ---------------------------------------------------------------------------
def bn_relu_kernel(y_ref, scale_ref, shift_ref, o_ref):
    y = y_ref[...] * scale_ref[...] + shift_ref[...]
    o_ref[...] = jnp.maximum(y, 0.0).astype(o_ref.dtype)


def _im2col_patches(x_nhwc, kp, mp):
    """(N,H,W,C) -> zero-padded bf16 patch matrix (MP, KP); column = tap*C + c."""
    N, H, W, C = x_nhwc.shape
    xp = jnp.pad(x_nhwc, ((0, 0), (1, 1), (1, 1), (0, 0)))
    cols = jnp.stack(
        [xp[:, kh:kh + H, kw:kw + W, :] for kh in range(3) for kw in range(3)],
        axis=3)                                            # (N, H, W, 9, C)
    p = cols.reshape(N * H * W, 9 * C).astype(jnp.bfloat16)
    return jnp.pad(p, ((0, mp - N * H * W), (0, kp - 9 * C)))


def _weight_matrix(w_oihw, kp, cp):
    """PyTorch OIHW -> (kh*kw*Cin, Cout), zero-padded bf16 (KP, CP)."""
    cout, cin = w_oihw.shape[0], w_oihw.shape[1]
    wk = jnp.transpose(w_oihw, (2, 3, 1, 0)).reshape(9 * cin, cout)
    return jnp.pad(wk.astype(jnp.bfloat16), ((0, kp - 9 * cin), (0, cp - cout)))


def conv_bn_relu(x_nhwc, w_oihw, gamma, beta, *, out_dtype, tm=256):
    N, H, W, Cin = x_nhwc.shape
    Cout = w_oihw.shape[0]
    M = N * H * W
    KP = _ceil_to(9 * Cin, LANE)
    CP = _ceil_to(Cout, LANE)
    MP = _ceil_to(M, tm)
    grid_m = MP // tm

    patches = _im2col_patches(x_nhwc, KP, MP)              # (MP, KP) bf16
    wk = _weight_matrix(w_oihw, KP, CP)                    # (KP, CP) bf16

    cost = pl.CostEstimate(
        flops=2 * MP * KP * CP,
        transcendentals=0,
        bytes_accessed=MP * KP * 2 + KP * CP * 2 + MP * CP * 4 + 2 * grid_m * CP * 4)

    y_raw, ssum, ssq = pl.pallas_call(
        conv_stats_kernel,
        grid=(grid_m,),
        in_specs=[
            pl.BlockSpec((tm, KP), lambda i: (i, 0)),
            pl.BlockSpec((KP, CP), lambda i: (0, 0)),
        ],
        out_specs=(
            pl.BlockSpec((tm, CP), lambda i: (i, 0)),
            pl.BlockSpec((1, 1, CP), lambda i: (i, 0, 0)),
            pl.BlockSpec((1, 1, CP), lambda i: (i, 0, 0)),
        ),
        out_shape=(
            jax.ShapeDtypeStruct((MP, CP), jnp.float32),
            jax.ShapeDtypeStruct((grid_m, 1, CP), jnp.float32),
            jax.ShapeDtypeStruct((grid_m, 1, CP), jnp.float32),
        ),
        compiler_params=pltpu.CompilerParams(
            dimension_semantics=("parallel",),
            vmem_limit_bytes=32 * 1024 * 1024),
        cost_estimate=cost,
    )(patches, wk)

    # Finalize GLOBAL BN statistics (tiny (CP,) math in plain JAX, f32).
    # Padded patch rows give exactly-zero conv outputs (no bias), so dividing by the
    # true M keeps the stats exact; padded channels get gamma=0 -> output 0.
    total = jnp.sum(ssum, axis=0)[0]
    total_sq = jnp.sum(ssq, axis=0)[0]
    mean = total / M
    var = jnp.maximum(total_sq / M - mean * mean, 0.0)     # biased var (BN training mode)
    inv = jax.lax.rsqrt(var + BN_EPS)
    g_pad = jnp.pad(gamma.astype(jnp.float32), (0, CP - Cout))
    b_pad = jnp.pad(beta.astype(jnp.float32), (0, CP - Cout))
    scale = (g_pad * inv).reshape(1, CP)
    shift = (b_pad - mean * g_pad * inv).reshape(1, CP)

    out = pl.pallas_call(
        bn_relu_kernel,
        grid=(grid_m,),
        in_specs=[
            pl.BlockSpec((tm, CP), lambda i: (i, 0)),
            pl.BlockSpec((1, CP), lambda i: (0, 0)),
            pl.BlockSpec((1, CP), lambda i: (0, 0)),
        ],
        out_specs=pl.BlockSpec((tm, CP), lambda i: (i, 0)),
        out_shape=jax.ShapeDtypeStruct((MP, CP), out_dtype),
        compiler_params=pltpu.CompilerParams(
            dimension_semantics=("parallel",),
            vmem_limit_bytes=32 * 1024 * 1024),
    )(y_raw, scale, shift)

    return out[:M, :Cout].reshape(N, H, W, Cout)


def double_conv(x_nchw, params):
    x = jnp.transpose(x_nchw, (0, 2, 3, 1))                # NCHW -> NHWC
    # Inter-layer activation kept in bf16: it is only consumed as a bf16 matmul
    # input by the second conv, so this halves the intermediate HBM traffic.
    x = conv_bn_relu(x, params["w1"], params["g1"], params["be1"],
                     out_dtype=jnp.bfloat16)
    x = conv_bn_relu(x, params["w2"], params["g2"], params["be2"],
                     out_dtype=jnp.float32)
    return jnp.transpose(x, (0, 3, 1, 2))                  # NHWC -> NCHW


def init_params(key, cin, cout):
    # Conv weights/biases ~ uniform(+-1/sqrt(fan_in)) like PyTorch defaults;
    # BN gamma=1, beta=0.  Biases are kept for the reference only: under
    # training-mode BN they cancel exactly, so the kernel omits them.
    k1, k2, k3, k4 = jax.random.split(key, 4)
    bound1 = 1.0 / (cin * 9) ** 0.5
    bound2 = 1.0 / (cout * 9) ** 0.5
    return {
        "w1": jax.random.uniform(k1, (cout, cin, 3, 3), jnp.float32, -bound1, bound1),
        "b1": jax.random.uniform(k2, (cout,), jnp.float32, -bound1, bound1),
        "g1": jnp.ones((cout,), jnp.float32),
        "be1": jnp.zeros((cout,), jnp.float32),
        "w2": jax.random.uniform(k3, (cout, cout, 3, 3), jnp.float32, -bound2, bound2),
        "b2": jax.random.uniform(k4, (cout,), jnp.float32, -bound2, bound2),
        "g2": jnp.ones((cout,), jnp.float32),
        "be2": jnp.zeros((cout,), jnp.float32),
    }


def _reference(x_nchw, params):
    # Pure-JAX reference of the PyTorch forward (training-mode BN, biased variance).
    # Conv inputs are cast to bf16 (f32 accumulation) to mirror the kernel's dtype
    # strategy; the conv bias IS applied here — it must cancel against the kernel.
    def conv(x, w, b):
        y = jax.lax.conv_general_dilated(
            x.astype(jnp.bfloat16), w.astype(jnp.bfloat16),
            window_strides=(1, 1), padding=((1, 1), (1, 1)),
            dimension_numbers=("NCHW", "OIHW", "NCHW"),
            preferred_element_type=jnp.float32)
        return y + b[None, :, None, None]

    def bn_relu(x, g, be):
        mean = jnp.mean(x, axis=(0, 2, 3), keepdims=True)
        var = jnp.mean((x - mean) ** 2, axis=(0, 2, 3), keepdims=True)
        y = (x - mean) * jax.lax.rsqrt(var + BN_EPS)
        y = y * g[None, :, None, None] + be[None, :, None, None]
        return jnp.maximum(y, 0.0)

    x = bn_relu(conv(x_nchw, params["w1"], params["b1"]), params["g1"], params["be1"])
    x = bn_relu(conv(x, params["w2"], params["b2"]), params["g2"], params["be2"])
    return x


if __name__ == "__main__":
    key = jax.random.PRNGKey(0)
    kx, kp = jax.random.split(key)
    N, Cin, H, W = 2, 4, 16, 16          # input_shape=4
    Cout = 8                              # output_shape=8
    x = jax.random.normal(kx, (N, Cin, H, W), jnp.float32)
    params = init_params(kp, Cin, Cout)

    out = jax.block_until_ready(double_conv(x, params))
    assert out.shape == (N, Cout, H, W), out.shape
    assert out.dtype == jnp.float32, out.dtype

    ref = _reference(x, params)
    max_err = float(jnp.max(jnp.abs(out - ref)))
    assert jnp.allclose(out, ref, rtol=1e-2, atol=1e-2), max_err

    print("KERNEL_OK")
</pallas_src>

<mosaic_0001>
module attributes {stable_mosaic.version = 11 : i64} {
  func.func @conv_stats_kernel(%arg0: i32, %arg1: memref<256x128xbf16, #tpu.memory_space<vmem>>, %arg2: memref<128x128xbf16, #tpu.memory_space<vmem>>, %arg3: memref<256x128xf32, #tpu.memory_space<vmem>>, %arg4: memref<1x1x128xf32, #tpu.memory_space<vmem>>, %arg5: memref<1x1x128xf32, #tpu.memory_space<vmem>>) attributes {dimension_semantics = [#tpu.dimension_semantics<parallel>], iteration_bounds = array<i64: 2>, scalar_prefetch = 0 : i64, scratch_operands = 0 : i64, tpu.core_type = #tpu.core_type<tc>, window_params = [{transform_indices = @transform_0, window_bounds = array<i64: 256, 128>}, {pipeline_mode = #tpu.pipeline_mode<synchronous>, transform_indices = @transform_1, window_bounds = array<i64: 128, 128>}, {transform_indices = @transform_2, window_bounds = array<i64: 256, 128>}, {transform_indices = @transform_3, window_bounds = array<i64: 1, 1, 128>}, {transform_indices = @transform_4, window_bounds = array<i64: 1, 1, 128>}]} {
    %c0 = arith.constant 0 : index
    %c0_0 = arith.constant 0 : index
    %0 = vector.load %arg1[%c0, %c0_0] : memref<256x128xbf16, #tpu.memory_space<vmem>>, vector<256x128xbf16>
    %c0_1 = arith.constant 0 : index
    %c0_2 = arith.constant 0 : index
    %1 = vector.load %arg2[%c0_1, %c0_2] : memref<128x128xbf16, #tpu.memory_space<vmem>>, vector<128x128xbf16>
    %cst = arith.constant dense<0.000000e+00> : vector<256x128xf32>
    %2 = tpu.matmul %0, %1, %cst {dimension_numbers = #tpu.dot_dimension_numbers<[1], [0], [0], [1], [0, 0, 1, 1], [], []>} : vector<256x128xbf16>, vector<128x128xbf16>, vector<256x128xf32> -> vector<256x128xf32>
    %c0_3 = arith.constant 0 : index
    %c0_4 = arith.constant 0 : index
    %3 = vector.load %arg3[%c0_3, %c0_4] : memref<256x128xf32, #tpu.memory_space<vmem>>, vector<256x128xf32>
    tpu.vector_store %arg3[%c0_3, %c0_4], %2 {strides = array<i32>} : memref<256x128xf32, #tpu.memory_space<vmem>>, vector<256x128xf32>,
    %cst_5 = arith.constant dense<0.000000e+00> : vector<128xf32>
    %4 = vector.multi_reduction <add>, %2, %cst_5 [0] : vector<256x128xf32> to vector<128xf32>
    %5 = vector.shape_cast %4 : vector<128xf32> to vector<1x128xf32>
    %6 = vector.shape_cast %5 : vector<1x128xf32> to vector<1x1x128xf32>
    %c0_6 = arith.constant 0 : index
    %c0_7 = arith.constant 0 : index
    %c0_8 = arith.constant 0 : index
    %7 = vector.load %arg4[%c0_6, %c0_7, %c0_8] : memref<1x1x128xf32, #tpu.memory_space<vmem>>, vector<1x1x128xf32>
    tpu.vector_store %arg4[%c0_6, %c0_7, %c0_8], %6 {strides = array<i32>} : memref<1x1x128xf32, #tpu.memory_space<vmem>>, vector<1x1x128xf32>,
    %8 = arith.mulf %2, %2 : vector<256x128xf32>
    %cst_9 = arith.constant dense<0.000000e+00> : vector<128xf32>
    %9 = vector.multi_reduction <add>, %8, %cst_9 [0] : vector<256x128xf32> to vector<128xf32>
    %10 = vector.shape_cast %9 : vector<128xf32> to vector<1x128xf32>
    %11 = vector.shape_cast %10 : vector<1x128xf32> to vector<1x1x128xf32>
    %c0_10 = arith.constant 0 : index
    %c0_11 = arith.constant 0 : index
    %c0_12 = arith.constant 0 : index
    %12 = vector.load %arg5[%c0_10, %c0_11, %c0_12] : memref<1x1x128xf32, #tpu.memory_space<vmem>>, vector<1x1x128xf32>
    tpu.vector_store %arg5[%c0_10, %c0_11, %c0_12], %11 {strides = array<i32>} : memref<1x1x128xf32, #tpu.memory_space<vmem>>, vector<1x1x128xf32>,
    return
  }
  func.func @transform_0(%arg0: i32) -> (i32, i32) {
    %c0_i32 = arith.constant 0 : i32
    %c0_i32_0 = arith.constant 0 : i32
    return %arg0, %c0_i32 : i32, i32
  }
  func.func @transform_1(%arg0: i32) -> (i32, i32) {
    %c0_i32 = arith.constant 0 : i32
    %c0_i32_0 = arith.constant 0 : i32
    %c0_i32_1 = arith.constant 0 : i32
    return %c0_i32, %c0_i32_0 : i32, i32
  }
  func.func @transform_2(%arg0: i32) -> (i32, i32) {
    %c0_i32 = arith.constant 0 : i32
    %c0_i32_0 = arith.constant 0 : i32
    return %arg0, %c0_i32 : i32, i32
  }
  func.func @transform_3(%arg0: i32) -> (i32, i32, i32) {
    %c0_i32 = arith.constant 0 : i32
    %c0_i32_0 = arith.constant 0 : i32
    %c0_i32_1 = arith.constant 0 : i32
    return %arg0, %c0_i32, %c0_i32_0 : i32, i32, i32
  }
  func.func @transform_4(%arg0: i32) -> (i32, i32, i32) {
    %c0_i32 = arith.constant 0 : i32
    %c0_i32_0 = arith.constant 0 : i32
    %c0_i32_1 = arith.constant 0 : i32
    return %arg0, %c0_i32, %c0_i32_0 : i32, i32, i32
  }
}

</mosaic_0001>

<bundles_post_ra>
// kernel: tpu_custom_call.1
= control target key start
LH: loop header
LB: loop body
LE: loop exit
PB: predicated region body
PF: predicated region fallthrough
CT: control target
= control target key end

     0   :  { %10 = vsyncpa [#allocation3], 0  ;;  %s1771_s0 = inlined_call_operand.hbm [shape: bf16[512,128], index: 0, kind: input, shape index: {}]   ;;  %s1772_s1 = inlined_call_operand.hbm [shape: bf16[128,128], index: 1, kind: input, shape index: {}]   ;;  %s1773_s2 = inlined_call_operand.hbm [shape: f32[512,128], index: 2, kind: output, shape index: {0}]   ;;  %s1774_s3 = inlined_call_operand.hbm [shape: f32[2,1,128], index: 3, kind: output, shape index: {1}]   ;;  %s1775_s4 = inlined_call_operand.hbm [shape: f32[2,1,128], index: 4, kind: output, shape index: {2}]  }
   0x1   :  { %12 = vsyncpa [#allocation3 + $0x1], 0 }
   0x2   :  { %13 = vsyncpa [#allocation6], 0 }
   0x3   :  { %14 = vsyncpa [#allocation4], 0 }
   0x4   :  { %16 = vsyncpa [#allocation4 + $0x1], 0 }
   0x5   :  { %17 = vsyncpa [#allocation9], 0 }
   0x6   :  { %19 = vsyncpa [#allocation9 + $0x1], 0  ;;  %s1368_s15 = smov 0   ;;  %s1370_s16 = smov 0  }
   0x7   :  { %s1372_s17 = smov 0   ;;  %s1374_s18 = smov 0  }
   0x8 LB: > { %s1389_s19 = sadd.s32 4294967295, %s1332_s18   ;;  %s1777_s20 = sadd.s32 4294967294, %s1332_s18   ;;  %s1332_s18 = sphi %s1374_s18, %s1799_s18   ;;  %s1328_s17 = sphi %s1372_s17, %s1798_s17   ;;  %s1324_s16 = sphi %s1370_s16, %s1797_s16   ;;  %s1320_s15 = sphi %s1368_s15, %s1796_s15  }
   0x9   : > { %p45_p0 = scmp.ne.s32.totalorder %s1324_s16, %s1320_s15  ;;  %p1776_p1 = scmp.eq.s32.totalorder %s1389_s19, 0 }
   0xa   : > { %p96_p3 = scmp.eq.s32.totalorder %s1777_s20, 1  ;;  %p928_p5 = scmp.ge.s32.totalorder %s1332_s18, 1 }
   0xb   : > { %p1400_p4 = por %p1776_p1, %p45_p0  ;;  %p155_p7 = scmp.lt.s32.totalorder %s1332_s18, 3 }
   0xc   : > { %p1405_p6 = por %p96_p3, %p45_p0  ;;  %s1334_s24 = smov [#allocation5]  }
   0xd   : > { %s1781_s21 = scalar_select %p1400_p4, 1, 0 }
   0xe   : > { %s1782_s22 = scalar_select %p1405_p6, 1, 0 }
   0xf   : > { %p1410_p8 = pnand %p928_p5, %p155_p7  ;;  %s167_s25 = sshll.u32 %s1334_s24, 4  ;;  %s168_s25 = int_to_ptr.vmem [resolvable:$true] %s167_s25 }
  0x10   : > { %s1424_s27 = sadd.s32 1, %s1332_s18   ;;  %s32_s28 = sadd.s32 1, %s1328_s17 }
  0x11   : > { %s1783_s23 = scalar_select %p1410_p8, 1, 0 }
  0x12   : > { %p1071_p9 = pneg %p1410_p8  ;;  %s29_s29 = ssub.s32 %s1332_s18, %s1424_s27 }
  0x13   : > { %s1165_s30 = scalar_lea.vmem %s168_s25, 1024  ;;  %p1173_p5 = scmp.lt.s32.totalorder %s168_s25, %s168_s25 }
  0x14   : > { %p1419_p11 = pnand %p1071_p9, %p1776_p1  ;;  %p1166_p13 = scmp.ne.s32.totalorder %s168_s25, %s1165_s30 }
  0x15   : > { %p1174_p7 = scmp.lt.s32.totalorder %s1165_s30, %s1165_s30 }
  0x16   : > { %p1156_p12 = pneg %p1419_p11 }
  0x17   : > { %p1175_p10 = por %p1174_p7, %p1173_p5 }
  0x18   : > { %p1168_p0 = pnand %p1166_p13, %p1156_p12 }
  0x1a   : > { %p1169_p3 = pneg %p1168_p0 }
  0x1c   : > { %p1176_p2 = pnand %p1175_p10, %p1169_p3 }
  0x1e   : > { %1179 = shalt.err (!%p1176_p2)
}
  0x1f   : > { %s1335_s5 = smov 64   ;;  %s1336_s6 = smov 4  }
  0x20   : > { %1074 = dma.hbm_to_vmem [thread:$0]  (!%p1419_p11), %s1772_s1, 1024, %s168_s25, [#allocation6], %s1335_s5, %s1335_s5, %s1336_s6  }
  0x21   : > { %p30_p2 = scmp.eq.s32.totalorder %s29_s29, 0  ;;  %p39_p9 = scmp.ne.s32.totalorder %s1328_s17, %s1324_s16 }
  0x22   : > { %p40_p10 = scmp.eq.s32.totalorder %s1332_s18, 0  ;;  %p1090_p12 = scmp.lt.s32.totalorder %s1332_s18, 2 }
  0x23   : > { %s1444_s9 = scalar_select %p30_p2, %s1328_s17, %s32_s28  }
  0x24   : > { %p41_p13 = por %p40_p10, %p39_p9  ;;  %p1785_p0 = scmp.eq.s32.totalorder %s1389_s19, 1 }
  0x25   : > { %s181_s11 = sand.u32 1, %s1328_s17   ;;  %s969_s12 = sshll.u32 %s1332_s18, 11 }
  0x26   : > { %p1448_p3 = por %p1785_p0, %p39_p9  ;;  %s931_s13 = sshll.u32 %s181_s11, 7 }
  0x27   : > { %s1457_s26 = scalar_lea.hbm %s1771_s0, %s969_s12  ;;  %s185_s25 = scalar_lea.vmem [#allocation2], %s931_s13 }
  0x28   : > { %s1786_s10 = scalar_select %p1448_p3, 1, 0 }
  0x29   : > { %s192_s28 = sshll.u32 %s185_s25, 4  ;;  %p1459_p11 = pnand %p1090_p12, %p41_p13  ;;  %s1463_s28 = int_to_ptr.vmem [resolvable:$true] %s192_s28 }
  0x2a   : > { %s1465_s30 = scalar_lea.sflag [#allocation3], %s181_s11  ;;  %s1180_s7 = scalar_lea.hbm %s1457_s26, 2048 }
  0x2b   : > { %p1181_p5 = scmp.ne.s32.totalorder %s1457_s26, %s1180_s7  ;;  %p1182_p7 = pneg %p1459_p11 }
  0x2c   : > { %s1185_s13 = scalar_lea.hbm %s1771_s0, 4096  ;;  %p1186_p10 = scmp.lt.s32.totalorder %s1457_s26, %s1771_s0 }
  0x2d   : > { %p1183_p2 = pnand %p1182_p7, %p1181_p5  ;;  %p1187_p12 = scmp.lt.s32.totalorder %s1185_s13, %s1180_s7 }
  0x2f   : > { %p1184_p9 = pneg %p1183_p2  ;;  %p1188_p13 = por %p1187_p12, %p1186_p10 }
  0x31   : > { %p1189_p0 = pnand %p1188_p13, %p1184_p9 }
  0x33   : > { %1192 = shalt.err (!%p1189_p0)
}
  0x34   : > { %s1193_s11 = scalar_lea.vmem %s1463_s28, 2048  ;;  %s1337_s25 = smov [#allocation2]  }
  0x35   : > { %p1194_p1 = scmp.ne.s32.totalorder %s1463_s28, %s1193_s11  ;;  %s1198_s20 = sshll.u32 %s1337_s25, 4  ;;  %s1199_s20 = int_to_ptr.vmem [resolvable:$false] %s1198_s20 }
  0x36   : > { %s1200_s8 = scalar_lea.vmem %s1199_s20, 4096  ;;  %p1201_p2 = scmp.lt.s32.totalorder %s1463_s28, %s1199_s20 }
  0x37   : > { %p1196_p6 = pnand %p1194_p1, %p1182_p7  ;;  %p1202_p3 = scmp.lt.s32.totalorder %s1200_s8, %s1193_s11 }
  0x39   : > { %p1197_p5 = pneg %p1196_p6  ;;  %p1203_p4 = por %p1202_p3, %p1201_p2 }
  0x3b   : > { %p1204_p8 = pnand %p1203_p4, %p1197_p5 }
  0x3d   : > { %1207 = shalt.err (!%p1204_p8)
}
  0x3e   : > { %1078 = dma.hbm_to_vmem [thread:$0]  (!%p1459_p11), %s1457_s26, 2048, %s1463_s28, %s1465_s30, %s1335_s5, %s1335_s5, %s1336_s6  }
  0x3f   : > { %p1788_p1 = scmp.ne.s32.totalorder %s1783_s23, 0 }
  0x40   : > { %s1492_s7 = sand.u32 (!%p1788_p1), 1, %s1324_s16   ;;  %p1789_p4 = scmp.ne.s32.totalorder (!%p1788_p1), %s1781_s21, 0 }
  0x41   : > { %204 = sbr.rel (%p1788_p1) target bundleno = 424 (0x1a8), region = 28  ;;  %s935_s20 = sshll.u32 (!%p1788_p1), %s1492_s7, 7 }
  0x42   : > { %s207_s12 = scalar_lea.sflag (!%p1788_p1), [#allocation3], %s1492_s7  ;;  %s1496_s13 = scalar_lea.vmem (!%p1788_p1), [#allocation2], %s935_s20 }
  0x46   : > { %1303 = dma.done.wait (%p1789_p4), %s207_s12, 2048  }
  0x47   : > { %1305 = vsyncadd (%p1789_p4), %s207_s12, 4294965248  ;;  %p1790_p6 = scmp.eq.s32.totalorder %s1389_s19, 0 }
  0x49   : > { %1307 = dma.done.wait (%p1790_p6), [#allocation6], 1024   ;;  %p1791_p8 = pmov %p1790_p6 }
  0x4a   : > { %v1130_v0 = vld [vmem:[#allocation5 + $0x38] sm:$0xff]   ;;  %v1131_v1 = vld [vmem:[#allocation5 + $0x30] sm:$0xff]   ;;  %v1132_v2 = vld [vmem:[#allocation5 + $0x28] sm:$0xff]   ;;  %s937_s21 = sshll.u32 %s1492_s7, 8  ;;  %s970_s5 = sshll.u32 %s1389_s19, 12 }
  0x4b   : > { %1309 = vsyncadd (%p1791_p8), [#allocation6], 4294966272  ;;  %995 = vmatprep.subr.bf16.mxu0 %v1130_v0  ;;  %1043 = vmatprep.subr.bf16.mxu1 %v1130_v0  ;;  %v1133_v3 = vld [vmem:[#allocation5 + $0x20] sm:$0xff]   ;;  %v1134_v5 = vld [vmem:[#allocation5 + $0x18] sm:$0xff]   ;;  %s1525_s23 = scalar_lea.vmem [#allocation7], %s937_s21  ;;  %s1602_s29 = scalar_lea.hbm %s1773_s2, %s970_s5 }
  0x4c   : > { %996 = vmatpush3.bf16.msra.mxu0 %v1130_v0  ;;  %1051 = vmatpush3.bf16.msra.mxu1 %v1130_v0  ;;  %v1138_v4 = vld [vmem:[%s1496_s13] sm:$0xff]   ;;  %v1135_v6 = vld [vmem:[#allocation5 + $0x10] sm:$0xff]   ;;  %v1136_v8 = vld [vmem:[#allocation5 + $0x8] sm:$0xff]   ;;  %s765_s6 = sshll.u32 %s1525_s23, 4  ;;  %s744_s30 = scalar_lea.sflag [#allocation4], %s1492_s7  ;;  %s1604_s6 = int_to_ptr.vmem [resolvable:$true] %s765_s6 }
  0x4d   : > { %997 = vmatprep.subr.bf16.mxu0 %v1131_v1  ;;  %1044 = vmatprep.subr.bf16.mxu1 %v1131_v1  ;;  %v1146_v7 = vld [vmem:[%s1496_s13 + $0x40] sm:$0xff]   ;;  %v1139_v10 = vld [vmem:[%s1496_s13 + $0x8] sm:$0xff]   ;;  %v1140_v12 = vld [vmem:[%s1496_s13 + $0x10] sm:$0xff]   ;;  %s1208_s14 = scalar_lea.vmem %s1604_s6, 4096  ;;  %p1792_p11 = scmp.ne.s32.totalorder %s1786_s10, 0 }
  0x4e   : > { %1011 = vmatprep.mubr.bf16.mxu0 %v1138_v4  ;;  %1027 = vmatprep.mubr.bf16.mxu1 %v1146_v7  ;;  %v1137_v9 = vld [vmem:[#allocation5] sm:$0xff]   ;;  %v1147_v11 = vld [vmem:[%s1496_s13 + $0x48] sm:$0xff]   ;;  %v1148_v13 = vld [vmem:[%s1496_s13 + $0x50] sm:$0xff]   ;;  %p1209_p3 = scmp.ne.s32.totalorder %s1604_s6, %s1208_s14  ;;  %s1338_s24 = smov [#allocation7]  }
  0x4f   : > { %v1141_v14 = vld [vmem:[%s1496_s13 + $0x18] sm:$0xff]   ;;  %v1142_v16 = vld [vmem:[%s1496_s13 + $0x20] sm:$0xff]   ;;  %v1143_v18 = vld [vmem:[%s1496_s13 + $0x28] sm:$0xff]   ;;  %s1212_s11 = sshll.u32 %s1338_s24, 4  ;;  %s1213_s11 = int_to_ptr.vmem [resolvable:$false] %s1212_s11 }
  0x50   : > { %998 = vmatpush3.bf16.msra.mxu0 %v1131_v1  ;;  %1052 = vmatpush3.bf16.msra.mxu1 %v1131_v1  ;;  %v1149_v15 = vld [vmem:[%s1496_s13 + $0x58] sm:$0xff]   ;;  %v1150_v17 = vld [vmem:[%s1496_s13 + $0x60] sm:$0xff]   ;;  %v1151_v19 = vld [vmem:[%s1496_s13 + $0x68] sm:$0xff]   ;;  %p1210_p7 = pnand %p1209_p3, %p1792_p11  ;;  %s1214_s25 = scalar_lea.vmem %s1213_s11, 8192 }
  0x51   : > { %999 = vmatprep.subr.bf16.mxu0 %v1132_v2  ;;  %1045 = vmatprep.subr.bf16.mxu1 %v1132_v2  ;;  %v1144_v20 = vld [vmem:[%s1496_s13 + $0x30] sm:$0xff]   ;;  %v1145_v22 = vld [vmem:[%s1496_s13 + $0x38] sm:$0xff]   ;;  %p1215_p10 = scmp.lt.s32.totalorder %s1604_s6, %s1213_s11  ;;  %p1216_p12 = scmp.lt.s32.totalorder %s1214_s25, %s1208_s14 }
  0x52   : > { %v1152_v21 = vld [vmem:[%s1496_s13 + $0x70] sm:$0xff]   ;;  %v1153_v23 = vld [vmem:[%s1496_s13 + $0x78] sm:$0xff]   ;;  %p1211_p9 = pneg %p1210_p7 }
  0x53   : > { %p1217_p13 = por %p1216_p12, %p1215_p10 }
  0x54   : > { %1000 = vmatpush3.bf16.msra.mxu0 %v1132_v2  ;;  %1053 = vmatpush3.bf16.msra.mxu1 %v1132_v2 }
  0x55   : > { %1001 = vmatprep.subr.bf16.mxu0 %v1133_v3  ;;  %1046 = vmatprep.subr.bf16.mxu1 %v1133_v3  ;;  %p1218_p0 = pnand %p1217_p13, %p1211_p9 }
  0x58   : > { %1002 = vmatpush3.bf16.msra.mxu0 %v1133_v3  ;;  %1054 = vmatpush3.bf16.msra.mxu1 %v1133_v3 }
  0x59   : > { %1003 = vmatprep.subr.bf16.mxu0 %v1134_v5  ;;  %1047 = vmatprep.subr.bf16.mxu1 %v1134_v5 }
  0x5c   : > { %1004 = vmatpush3.bf16.msra.mxu0 %v1134_v5  ;;  %1055 = vmatpush3.bf16.msra.mxu1 %v1134_v5 }
  0x5d   : > { %1005 = vmatprep.subr.bf16.mxu0 %v1135_v6  ;;  %1048 = vmatprep.subr.bf16.mxu1 %v1135_v6 }
  0x60   : > { %1006 = vmatpush3.bf16.msra.mxu0 %v1135_v6  ;;  %1056 = vmatpush3.bf16.msra.mxu1 %v1135_v6 }
  0x61   : > { %1007 = vmatprep.subr.bf16.mxu0 %v1136_v8  ;;  %1049 = vmatprep.subr.bf16.mxu1 %v1136_v8 }
  0x64   : > { %1008 = vmatpush3.bf16.msra.mxu0 %v1136_v8  ;;  %1057 = vmatpush3.bf16.msra.mxu1 %v1136_v8 }
  0x65   : > { %1009 = vmatprep.subr.bf16.mxu0 %v1137_v9  ;;  %1050 = vmatprep.subr.bf16.mxu1 %v1137_v9 }
  0x68   : > { %1010 = vmatpush3.bf16.msra.mxu0 %v1137_v9  ;;  %1058 = vmatpush3.bf16.msra.mxu1 %v1137_v9 }
  0x6b   : > { %1012 = vmatmul.mubr.bf16.vlgmr.msra.gmra.mxu0 %v1139_v10  ;;  %1028 = vmatmul.mubr.bf16.vlgmr.msra.gmra.mxu1 %v1147_v11 }
  0x6c   : > { %1015 = vmatprep.mubr.bf16.mxu0 %v1140_v12  ;;  %1031 = vmatprep.mubr.bf16.mxu1 %v1148_v13 }
  0x73   : > { %1016 = vmatmul.mubr.bf16.gmra.mxu0 %v1141_v14  ;;  %1032 = vmatmul.mubr.bf16.gmra.mxu1 %v1149_v15 }
  0x74   : > { %1019 = vmatprep.mubr.bf16.mxu0 %v1142_v16  ;;  %1035 = vmatprep.mubr.bf16.mxu1 %v1150_v17 }
  0x7b   : > { %1020 = vmatmul.mubr.bf16.gmra.mxu0 %v1143_v18  ;;  %1036 = vmatmul.mubr.bf16.gmra.mxu1 %v1151_v19 }
  0x7c   : > { %1023 = vmatprep.mubr.bf16.mxu0 %v1144_v20  ;;  %1039 = vmatprep.mubr.bf16.mxu1 %v1152_v21 }
  0x83   : > { %1024 = vmatmul.mubr.bf16.gmra.mxu0 %v1145_v22  ;;  %1040 = vmatmul.mubr.bf16.gmra.mxu1 %v1153_v23 }
 0x12b   : > { %v1013_v24 = vpop.f32.mrf.mxu0  ;;  %v1523_v25 = vpop.f32.mrf.mxu1 }
 0x12c   : > { %605 = vst [vmem:[%s1525_s23 + $0x10] sm:$0xff] %v1013_v24  ;;  %621 = vst [vmem:[%s1525_s23 + $0x90] sm:$0xff] %v1523_v25  ;;  %v675_v37 = vmul.f32 %v1013_v24, %v1013_v24 }
 0x12d   : > { %v476_v26 = vpop.f32.mrf.mxu0  ;;  %v1530_v27 = vpop.f32.mrf.mxu1 }
 0x12e   : > { %603 = vst [vmem:[%s1525_s23] sm:$0xff] %v476_v26  ;;  %619 = vst [vmem:[%s1525_s23 + $0x80] sm:$0xff] %v1530_v27  ;;  %v673_v32 = vmul.f32 %v476_v26, %v476_v26 }
 0x12f   : > { %v1014_v28 = vpop.f32.mrf.mxu0  ;;  %v1535_v29 = vpop.f32.mrf.mxu1 }
 0x130   : > { %606 = vst [vmem:[%s1525_s23 + $0x18] sm:$0xff] %v1014_v28  ;;  %622 = vst [vmem:[%s1525_s23 + $0x98] sm:$0xff] %v1535_v29  ;;  %v676_v42 = vmul.f32 %v1014_v28, %v1014_v28 }
 0x131   : > { %v479_v30 = vpop.f32.mrf.mxu0  ;;  %v1540_v31 = vpop.f32.mrf.mxu1 }
 0x132   : > { %604 = vst [vmem:[%s1525_s23 + $0x8] sm:$0xff] %v479_v30  ;;  %v635_v33 = vadd.f32 %v479_v30, %v476_v26  ;;  %v674_v34 = vmul.f32 %v479_v30, %v479_v30  ;;  %620 = vst [vmem:[%s1525_s23 + $0x88] sm:$0xff] %v1540_v31 }
 0x133   : > { %v1017_v35 = vpop.f32.mrf.mxu0  ;;  %v1545_v36 = vpop.f32.mrf.mxu1 }
 0x134   : > { %v636_v38 = vadd.f32 %v1013_v24, %v635_v33  ;;  %v705_v39 = vadd.f32 %v674_v34, %v673_v32  ;;  %609 = vst [vmem:[%s1525_s23 + $0x30] sm:$0xff] %v1017_v35  ;;  %625 = vst [vmem:[%s1525_s23 + $0xb0] sm:$0xff] %v1545_v36  ;;  %v679_v57 = vmul.f32 %v1017_v35, %v1017_v35 }
 0x135   : > { %v492_v40 = vpop.f32.mrf.mxu0  ;;  %v1550_v41 = vpop.f32.mrf.mxu1 }
 0x136   : > { %v706_v43 = vadd.f32 %v705_v39, %v675_v37  ;;  %607 = vst [vmem:[%s1525_s23 + $0x20] sm:$0xff] %v492_v40  ;;  %v637_v44 = vadd.f32 %v1014_v28, %v636_v38  ;;  %623 = vst [vmem:[%s1525_s23 + $0xa0] sm:$0xff] %v1550_v41  ;;  %v677_v48 = vmul.f32 %v492_v40, %v492_v40 }
 0x137   : > { %v1018_v45 = vpop.f32.mrf.mxu0  ;;  %v1555_v46 = vpop.f32.mrf.mxu1 }
 0x138   : > { %v638_v47 = vadd.f32 %v637_v44, %v492_v40  ;;  %v707_v49 = vadd.f32 %v706_v43, %v676_v42  ;;  %610 = vst [vmem:[%s1525_s23 + $0x38] sm:$0xff] %v1018_v45  ;;  %626 = vst [vmem:[%s1525_s23 + $0xb8] sm:$0xff] %v1555_v46  ;;  %v680_v62 = vmul.f32 %v1018_v45, %v1018_v45 }
 0x139   : > { %v495_v50 = vpop.f32.mrf.mxu0  ;;  %v1560_v51 = vpop.f32.mrf.mxu1 }
 0x13a   : > { %v708_v52 = vadd.f32 %v707_v49, %v677_v48  ;;  %608 = vst [vmem:[%s1525_s23 + $0x28] sm:$0xff] %v495_v50  ;;  %v639_v53 = vadd.f32 %v638_v47, %v495_v50  ;;  %v678_v54 = vmul.f32 %v495_v50, %v495_v50  ;;  %624 = vst [vmem:[%s1525_s23 + $0xa8] sm:$0xff] %v1560_v51 }
 0x13b   : > { %v1021_v55 = vpop.f32.mrf.mxu0  ;;  %v1565_v56 = vpop.f32.mrf.mxu1 }
 0x13c   : > { %v640_v58 = vadd.f32 %v1017_v35, %v639_v53  ;;  %v709_v59 = vadd.f32 %v708_v52, %v678_v54  ;;  %613 = vst [vmem:[%s1525_s23 + $0x50] sm:$0xff] %v1021_v55  ;;  %629 = vst [vmem:[%s1525_s23 + $0xd0] sm:$0xff] %v1565_v56  ;;  %v683_v13 = vmul.f32 %v1021_v55, %v1021_v55 }
 0x13d   : > { %v508_v60 = vpop.f32.mrf.mxu0  ;;  %v1570_v61 = vpop.f32.mrf.mxu1 }
 0x13e   : > { %v710_v63 = vadd.f32 %v709_v59, %v679_v57  ;;  %611 = vst [vmem:[%s1525_s23 + $0x40] sm:$0xff] %v508_v60  ;;  %v641_v0 = vadd.f32 %v1018_v45, %v640_v58  ;;  %627 = vst [vmem:[%s1525_s23 + $0xc0] sm:$0xff] %v1570_v61  ;;  %v681_v4 = vmul.f32 %v508_v60, %v508_v60 }
 0x13f   : > { %v1022_v1 = vpop.f32.mrf.mxu0  ;;  %v1575_v2 = vpop.f32.mrf.mxu1 }
 0x140   : > { %v642_v3 = vadd.f32 %v641_v0, %v508_v60  ;;  %v711_v5 = vadd.f32 %v710_v63, %v680_v62  ;;  %614 = vst [vmem:[%s1525_s23 + $0x58] sm:$0xff] %v1022_v1  ;;  %630 = vst [vmem:[%s1525_s23 + $0xd8] sm:$0xff] %v1575_v2  ;;  %v684_v18 = vmul.f32 %v1022_v1, %v1022_v1 }
 0x141   : > { %v511_v6 = vpop.f32.mrf.mxu0  ;;  %v1580_v7 = vpop.f32.mrf.mxu1 }
 0x142   : > { %v712_v8 = vadd.f32 %v711_v5, %v681_v4  ;;  %612 = vst [vmem:[%s1525_s23 + $0x48] sm:$0xff] %v511_v6  ;;  %v643_v9 = vadd.f32 %v642_v3, %v511_v6  ;;  %v682_v10 = vmul.f32 %v511_v6, %v511_v6  ;;  %628 = vst [vmem:[%s1525_s23 + $0xc8] sm:$0xff] %v1580_v7 }
 0x143   : > { %v1025_v11 = vpop.f32.mrf.mxu0  ;;  %v1585_v12 = vpop.f32.mrf.mxu1 }
 0x144   : > { %v644_v14 = vadd.f32 %v1021_v55, %v643_v9  ;;  %v713_v15 = vadd.f32 %v712_v8, %v682_v10  ;;  %617 = vst [vmem:[%s1525_s23 + $0x70] sm:$0xff] %v1025_v11  ;;  %633 = vst [vmem:[%s1525_s23 + $0xf0] sm:$0xff] %v1585_v12 }
 0x145   : > { %v524_v16 = vpop.f32.mrf.mxu0  ;;  %v1592_v17 = vpop.f32.mrf.mxu1 }
 0x146   : > { %v714_v19 = vadd.f32 %v713_v15, %v683_v13  ;;  %615 = vst [vmem:[%s1525_s23 + $0x60] sm:$0xff] %v524_v16  ;;  %v645_v20 = vadd.f32 %v1022_v1, %v644_v14  ;;  %631 = vst [vmem:[%s1525_s23 + $0xe0] sm:$0xff] %v1592_v17  ;;  %v685_v24 = vmul.f32 %v524_v16, %v524_v16 }
 0x147   : > { %v1026_v21 = vpop.f32.mrf.mxu0  ;;  %v1597_v22 = vpop.f32.mrf.mxu1 }
 0x148   : > { %v646_v23 = vadd.f32 %v645_v20, %v524_v16  ;;  %v715_v26 = vadd.f32 %v714_v19, %v684_v18  ;;  %618 = vst [vmem:[%s1525_s23 + $0x78] sm:$0xff] %v1026_v21  ;;  %634 = vst [vmem:[%s1525_s23 + $0xf8] sm:$0xff] %v1597_v22 }
 0x149   : > { %v527_v28 = vpop.f32.mrf.mxu0  ;;  %v1609_v30 = vpop.f32.mrf.mxu1 }
 0x14a   : > { %v716_v32 = vadd.f32 %v715_v26, %v685_v24  ;;  %616 = vst [vmem:[%s1525_s23 + $0x68] sm:$0xff] %v527_v28  ;;  %v647_v33 = vadd.f32 %v646_v23, %v527_v28  ;;  %v686_v34 = vmul.f32 %v527_v28, %v527_v28  ;;  %632 = vst [vmem:[%s1525_s23 + $0xe8] sm:$0xff] %v1609_v30 }
 0x14b   : > { %1221 = shalt.err (!%p1218_p0)
}
 0x14c   : > { %s1222_s8 = scalar_lea.hbm %s1602_s29, 4096  ;;  %s1226_s13 = scalar_lea.hbm %s1773_s2, 8192 }
 0x14d   : > { %p1223_p5 = scmp.ne.s32.totalorder %s1602_s29, %s1222_s8  ;;  %p1227_p4 = scmp.lt.s32.totalorder %s1602_s29, %s1773_s2 }
 0x14e   : > { %p1228_p6 = scmp.lt.s32.totalorder %s1226_s13, %s1222_s8 }
 0x14f   : > { %p1224_p2 = pnand %p1223_p5, %p1792_p11 }
 0x150   : > { %p1229_p8 = por %p1228_p6, %p1227_p4 }
 0x151   : > { %p1225_p1 = pneg %p1224_p2 }
 0x153   : > { %p1230_p3 = pnand %p1229_p8, %p1225_p1 }
 0x155   : > { %1233 = shalt.err (!%p1230_p3)
}
 0x156   : > { %s1339_s5 = smov 128   ;;  %s1340_s26 = smov 8   ;;  %v687_v35 = vmul.f32 %v1025_v11, %v1025_v11  ;;  %v648_v37 = vadd.f32 %v1025_v11, %v647_v33  ;;  %v717_v38 = vadd.f32 %v716_v32, %v686_v34  ;;  %v688_v39 = vmul.f32 %v1026_v21, %v1026_v21 }
 0x157   : > { %1065 = dma.vmem_to_hbm [thread:$0]  (%p1792_p11), %s1604_s6, 4096, %s1602_s29, %s744_s30, %s1339_s5, %s1339_s5, %s1340_s26   ;;  %v689_v43 = vmul.f32 %v1530_v27, %v1530_v27  ;;  %v690_v48 = vmul.f32 %v1540_v31, %v1540_v31  ;;  %v691_v50 = vmul.f32 %v1523_v25, %v1523_v25  ;;  %v692_v54 = vmul.f32 %v1535_v29, %v1535_v29 }
 0x158   : > { %v649_v40 = vadd.f32 %v1026_v21, %v648_v37  ;;  %v718_v42 = vadd.f32 %v717_v38, %v687_v35  ;;  %v693_v58 = vmul.f32 %v1550_v41, %v1550_v41  ;;  %v694_v62 = vmul.f32 %v1560_v51, %v1560_v51  ;;  %s748_s6 = sand.u32 1, %s1389_s19   ;;  %s965_s28 = sshll.u32 %s1389_s19, 4 }
 0x159   : > { %v697_v4 = vmul.f32 %v1570_v61, %v1570_v61  ;;  %v698_v8 = vmul.f32 %v1580_v7, %v1580_v7  ;;  %v701_v14 = vmul.f32 %v1592_v17, %v1592_v17  ;;  %v703_v18 = vmul.f32 %v1585_v12, %v1585_v12  ;;  %s240_s29 = scalar_lea.vmem [#allocation8], %s1492_s7  ;;  %s246_s14 = scalar_lea.vmem [#allocation10], %s1492_s7 }
 0x15a   : > { %v719_v44 = vadd.f32 %v718_v42, %v688_v39  ;;  %v650_v45 = vadd.f32 %v649_v40, %v1530_v27  ;;  %v704_v20 = vmul.f32 %v1597_v22, %v1597_v22  ;;  %s781_s30 = sshll.u32 %s240_s29, 4  ;;  %s794_s24 = sshll.u32 %s246_s14, 4  ;;  %s1696_s30 = int_to_ptr.vmem [resolvable:$true] %s781_s30  ;;  %s1703_s24 = int_to_ptr.vmem [resolvable:$true] %s794_s24 }
 0x15b   : > { %s1694_s8 = scalar_lea.hbm %s1774_s3, %s965_s28  ;;  %s1701_s12 = scalar_lea.hbm %s1775_s4, %s965_s28 }
 0x15c   : > { %v651_v47 = vadd.f32 %v650_v45, %v1540_v31  ;;  %v720_v49 = vadd.f32 %v719_v44, %v689_v43  ;;  %s1705_s13 = scalar_lea.sflag [#allocation9], %s748_s6  ;;  %s1234_s21 = scalar_lea.vmem %s1696_s30, 16 }
 0x15d   : > { %p1235_p7 = scmp.ne.s32.totalorder %s1696_s30, %s1234_s21  ;;  %s1341_s23 = smov [#allocation8]  }
 0x15e   : > { %v652_v52 = vadd.f32 %v1523_v25, %v651_v47  ;;  %v721_v53 = vadd.f32 %v720_v49, %v690_v48  ;;  %v695_v25 = vmul.f32 %v1545_v36, %v1545_v36  ;;  %s1238_s5 = sshll.u32 %s1341_s23, 4  ;;  %s1239_s5 = int_to_ptr.vmem [resolvable:$false] %s1238_s5 }
 0x15f   : > { %p1236_p9 = pnand %p1235_p7, %p1792_p11  ;;  %s1240_s26 = scalar_lea.vmem %s1239_s5, 32 }
 0x160   : > { %v722_v55 = vadd.f32 %v721_v53, %v691_v50  ;;  %v653_v57 = vadd.f32 %v1535_v29, %v652_v52  ;;  %v696_v29 = vmul.f32 %v1555_v46, %v1555_v46  ;;  %p1241_p12 = scmp.lt.s32.totalorder %s1696_s30, %s1239_s5  ;;  %p1242_p13 = scmp.lt.s32.totalorder %s1240_s26, %s1234_s21 }
 0x161   : > { %p1237_p10 = pneg %p1236_p9 }
 0x162   : > { %v654_v27 = vadd.f32 %v653_v57, %v1550_v41  ;;  %v723_v59 = vadd.f32 %v722_v55, %v692_v54  ;;  %p1243_p0 = por %p1242_p13, %p1241_p12 }
 0x164   : > { %v724_v31 = vadd.f32 %v723_v59, %v693_v58  ;;  %v655_v60 = vadd.f32 %v654_v27, %v1560_v51  ;;  %p1244_p5 = pnand %p1243_p0, %p1237_p10 }
 0x166   : > { %v656_v63 = vadd.f32 %v1545_v36, %v655_v60  ;;  %v725_v0 = vadd.f32 %v724_v31, %v694_v62  ;;  %v699_v36 = vmul.f32 %v1565_v56, %v1565_v56 }
 0x168   : > { %v726_v1 = vadd.f32 %v725_v0, %v695_v25  ;;  %v657_v3 = vadd.f32 %v1555_v46, %v656_v63  ;;  %v700_v46 = vmul.f32 %v1575_v2, %v1575_v2 }
 0x16a   : > { %v658_v41 = vadd.f32 %v657_v3, %v1570_v61  ;;  %v727_v5 = vadd.f32 %v726_v1, %v696_v29 }
 0x16c   : > { %v728_v6 = vadd.f32 %v727_v5, %v697_v4  ;;  %v659_v51 = vadd.f32 %v658_v41, %v1580_v7 }
 0x16e   : > { %v660_v9 = vadd.f32 %v1565_v56, %v659_v51  ;;  %v729_v10 = vadd.f32 %v728_v6, %v698_v8  ;;  %v702_v56 = vmul.f32 %v1609_v30, %v1609_v30 }
 0x170   : > { %v730_v11 = vadd.f32 %v729_v10, %v699_v36  ;;  %v661_v13 = vadd.f32 %v1575_v2, %v660_v9 }
 0x172   : > { %v662_v61 = vadd.f32 %v661_v13, %v1592_v17  ;;  %v731_v15 = vadd.f32 %v730_v11, %v700_v46 }
 0x174   : > { %v732_v16 = vadd.f32 %v731_v15, %v701_v14  ;;  %v663_v7 = vadd.f32 %v662_v61, %v1609_v30 }
 0x176   : > { %v664_v2 = vadd.f32 %v1585_v12, %v663_v7  ;;  %v733_v19 = vadd.f32 %v732_v16, %v702_v56 }
 0x178   : > { %v665_v17 = vadd.f32 %v1597_v22, %v664_v2  ;;  %v734_v21 = vadd.f32 %v733_v19, %v703_v18 }
 0x17a   : > { %v666_v23 = vrot.slane %v665_v17, 4  ;;  %v735_v24 = vadd.f32 %v734_v21, %v704_v20 }
 0x17c   : > { %v667_v26 = vadd.f32 %v666_v23, %v665_v17  ;;  %v736_v28 = vrot.slane %v735_v24, 4 }
 0x17e   : > { %v668_v30 = vrot.slane %v667_v26, 2  ;;  %v737_v32 = vadd.f32 %v736_v28, %v735_v24 }
 0x180   : > { %v669_v33 = vadd.f32 %v668_v30, %v667_v26  ;;  %v738_v34 = vrot.slane %v737_v32, 2 }
 0x182   : > { %v670_v12 = vrot.slane %v669_v33, 1  ;;  %v739_v35 = vadd.f32 %v738_v34, %v737_v32 }
 0x184   : > { %v740_v22 = vrot.slane %v739_v35, 1  ;;  %v671_v37 = vadd.f32 %v670_v12, %v669_v33 }
 0x186   : > { %672 = vst [vmem:[%s240_s29] sm:$0x1] %v671_v37  ;;  %v741_v38 = vadd.f32 %v740_v22, %v739_v35 }
 0x187   : > { %1247 = shalt.err (!%p1244_p5)
}
 0x188   : > { %s1248_s6 = scalar_lea.hbm %s1694_s8, 16  ;;  %s1252_s11 = scalar_lea.hbm %s1774_s3, 32 }
 0x189   : > { %p1249_p2 = scmp.ne.s32.totalorder %s1694_s8, %s1248_s6  ;;  %p1253_p6 = scmp.lt.s32.totalorder %s1694_s8, %s1774_s3 }
 0x18a   : > { %p1254_p8 = scmp.lt.s32.totalorder %s1252_s11, %s1248_s6 }
 0x18b   : > { %p1250_p1 = pnand %p1249_p2, %p1792_p11 }
 0x18c   : > { %p1255_p3 = por %p1254_p8, %p1253_p6 }
 0x18d   : > { %p1251_p4 = pneg %p1250_p1 }
 0x18f   : > { %p1256_p7 = pnand %p1255_p3, %p1251_p4 }
 0x191   : > { %1259 = shalt.err (!%p1256_p7)
}
 0x192   : > { %1066 = dma.vmem_to_hbm [thread:$0]  (%p1792_p11), %s1696_s30, 16, %s1694_s8, %s1705_s13   ;;  %742 = vst [vmem:[%s246_s14] sm:$0x1] %v741_v38 }
 0x193   : > { %s1260_s20 = scalar_lea.vmem %s1703_s24, 16  ;;  %s1342_s21 = smov [#allocation10]  }
 0x194   : > { %p1261_p9 = scmp.ne.s32.totalorder %s1703_s24, %s1260_s20  ;;  %s1264_s23 = sshll.u32 %s1342_s21, 4  ;;  %s1265_s23 = int_to_ptr.vmem [resolvable:$false] %s1264_s23 }
 0x195   : > { %s1266_s5 = scalar_lea.vmem %s1265_s23, 32  ;;  %p1267_p13 = scmp.lt.s32.totalorder %s1703_s24, %s1265_s23 }
 0x196   : > { %p1262_p10 = pnand %p1261_p9, %p1792_p11  ;;  %p1268_p0 = scmp.lt.s32.totalorder %s1266_s5, %s1260_s20 }
 0x198   : > { %p1263_p12 = pneg %p1262_p10  ;;  %p1269_p5 = por %p1268_p0, %p1267_p13 }
 0x19a   : > { %p1270_p2 = pnand %p1269_p5, %p1263_p12 }
 0x19c   : > { %1273 = shalt.err (!%p1270_p2)
}
 0x19d   : > { %s1274_s7 = scalar_lea.hbm %s1701_s12, 16  ;;  %s1278_s8 = scalar_lea.hbm %s1775_s4, 32 }
 0x19e   : > { %p1275_p1 = scmp.ne.s32.totalorder %s1701_s12, %s1274_s7  ;;  %p1279_p8 = scmp.lt.s32.totalorder %s1701_s12, %s1775_s4 }
 0x19f   : > { %p1280_p3 = scmp.lt.s32.totalorder %s1278_s8, %s1274_s7 }
 0x1a0   : > { %p1276_p4 = pnand %p1275_p1, %p1792_p11 }
 0x1a1   : > { %p1281_p7 = por %p1280_p3, %p1279_p8 }
 0x1a2   : > { %p1277_p6 = pneg %p1276_p4 }
 0x1a4   : > { %p1282_p9 = pnand %p1281_p7, %p1277_p6 }
 0x1a6   : > { %1285 = shalt.err (!%p1282_p9)
}
 0x1a7   : > { %1067 = dma.vmem_to_hbm [thread:$0]  (%p1792_p11), %s1703_s24, 16, %s1701_s12, %s1705_s13  }
 0x1a8 PF: > { %s806_s28 = sand.u32 1, %s1320_s15   ;;  %p1793_p10 = scmp.ne.s32.totalorder %s1782_s22, 0 }
 0x1a9   : > { %p1794_p12 = scmp.ge.s32.totalorder %s1332_s18, 2  ;;  %s807_s29 = scalar_lea.sflag [#allocation4], %s806_s28 }
 0x1ab   : > { %p1080_p13 = pnand %p1794_p12, %p1793_p10 }
 0x1ad   : > { %p1081_p0 = pneg %p1080_p13 }
 0x1af   : > { %1311 = dma.done.wait (%p1081_p0), %s807_s29, 4096  }
 0x1b0   : > { %1313 = vsyncadd (%p1081_p0), %s807_s29, 4294963200  ;;  %s1795_s11 = sadd.s32 4294967294, %s1332_s18  }
 0x1b1   : > { %s815_s25 = sand.u32 1, %s1795_s11  }
 0x1b2   : > { %s816_s10 = scalar_lea.sflag [#allocation9], %s815_s25 }
 0x1b3   : > { %1315 = dma.done.wait (%p1081_p0), %s816_s10, 32  }
 0x1b4   : > { %1317 = vsyncadd (%p1081_p0), %s816_s10, 4294967264  ;;  %p22_p11 = scmp.ge.s32.totalorder %s1424_s27, 4   ;;  %s1796_s15 = smov %s1324_s16 }
 0x1b5   : > { %s1797_s16 = smov %s1328_s17  ;;  %s1798_s17 = smov %s1444_s9 }
 0x1b6   : > { %s1799_s18 = smov %s1424_s27  ;;  %24 = sbr.rel (!%p22_p11) target bundleno = 8 (0x8), region = 109 }
 0x1bb   :  { %828 = vsyncpa [#allocation3], 1 }
 0x1bc   :  { %830 = vsyncpa [#allocation3 + $0x1], 1 }
 0x1bd   :  { %831 = vsyncpa [#allocation6], 1 }
 0x1be   :  { %832 = vsyncpa [#allocation4], 1 }
 0x1bf   :  { %834 = vsyncpa [#allocation4 + $0x1], 1 }
 0x1c0   :  { %835 = vsyncpa [#allocation9], 1 }
 0x1c1   :  { %837 = vsyncpa [#allocation9 + $0x1], 1 }

</bundles_post_ra>
